<compile_context>
chip_gen: v6e
topology: v6e:2x2x1
jax: 0.10.0
libtpu: 0.0.40
codegen_flags: <defaults>
</compile_context>

<pallas_src>
import functools
import math

import jax
import jax.numpy as jnp
from jax.experimental import pallas as pl
from jax.experimental.pallas import tpu as pltpu


def _round_up(x, m):
    return ((x + m - 1) // m) * m


def _trunk_heads_kernel(depth_body, D, t_ref, packa_ref, packb_ref, out_ref):
    """packa: [w1(1,D); b1(1,D); b2(depth,D); w2(depth*D,D)]   packb: [weff(D,NP); beff(1,NP)]"""
    hi = jax.lax.Precision.HIGHEST

    w1 = packa_ref[0:1, :]                                  # (1, D)
    b1 = packa_ref[1:2, :]                                  # (1, D)

    # Layer 1: (TB,1) x (1,D) outer product -> VPU broadcast, not MXU.
    x = jnp.tanh(t_ref[...] * w1 + b1)                      # (TB, D)

    # Shared trunk, statically unrolled; all slices are static (w2[m] starts at
    # row 2+depth + m*D, a multiple of 8, so no partial-tile slicing).
    w2_base = 2 + depth_body
    for m in range(depth_body):
        w2m = packa_ref[w2_base + m * D: w2_base + (m + 1) * D, :]   # (D, D)
        b2m = packa_ref[2 + m: 3 + m, :]                             # (1, D)
        x = jnp.tanh(
            jnp.dot(x, w2m, precision=hi, preferred_element_type=jnp.float32)
            + b2m)                                                   # (TB, D)

    # All N heads at once (pre-folded, zero-padded to 128 lanes):
    # single matmul + single unmasked lane-dense store.
    weff = packb_ref[0:D, :]                                # (D, NP)
    beff = packb_ref[D:D + 1, :]                            # (1, NP)
    out_ref[...] = (
        jnp.dot(x, weff, precision=hi, preferred_element_type=jnp.float32)
        + beff).astype(out_ref.dtype)                       # (TB, NP)


def prepare_params(params):
    """One-time parameter prep (call once, outside the per-forward path).

    Returns (packa, packb, meta) where
      packa: (2 + depth + depth*D, D) f32  = [w1; b1; b2; w2-stacked]
      packb: (D + 1, NP) f32               = [weff zero-padded to NP lanes; beff]
      meta : (depth, D, N, F, NP) static ints
    """
    w1, b1 = params["w1"], params["b1"]          # (1, D), (1, D)
    w2, b2 = params["w2"], params["b2"]          # (depth, D, D), (depth, 1, D)
    wa, ba = params["wa"], params["ba"]          # (N, D, H), (N, 1, H)
    wo, bo = params["wo"], params["bo"]          # (N, H, 4), (N, 1, 4)

    depth, D, _ = w2.shape
    N, _, F = wo.shape

    hi = jax.lax.Precision.HIGHEST
    # Exact algebraic fold of each head's two linears (no nonlinearity between):
    #   y_n = x @ (Wa[n] @ Wo[n]) + (ba[n] @ Wo[n] + bo[n])
    weff = jnp.einsum("ndh,nhf->dnf", wa, wo, precision=hi).reshape(D, N * F)
    beff = (jnp.einsum("nih,nhf->inf", ba, wo, precision=hi)
            + jnp.transpose(bo, (1, 0, 2))).reshape(1, N * F)

    NP = int(pl.cdiv(N * F, 128)) * 128          # lane-dense output width
    weff_p = jnp.pad(weff, ((0, 0), (0, NP - N * F))).astype(jnp.float32)
    beff_p = jnp.pad(beff, ((0, 0), (0, NP - N * F))).astype(jnp.float32)

    packa = jnp.concatenate(
        [w1.astype(jnp.float32),
         b1.astype(jnp.float32),
         b2.reshape(depth, D).astype(jnp.float32),
         w2.reshape(depth * D, D).astype(jnp.float32)], axis=0)
    packb = jnp.concatenate([weff_p, beff_p], axis=0)

    meta = (int(depth), int(D), int(N), int(F), NP)
    return packa, packb, meta


def make_forward_fn(meta, row_block=256):
    """Build a jitted forward(t, packa, packb) -> (B, N, 4)."""
    depth_body, D, N, F, NP = meta

    @jax.jit
    def forward(t, packa, packb):
        B = t.shape[0]
        TB = min(row_block, _round_up(B, 8))     # row block (multiple of 8 sublanes)
        Bp = _round_up(B, TB)
        t_pad = jnp.pad(t.astype(jnp.float32), ((0, Bp - B), (0, 0)))

        out = pl.pallas_call(
            functools.partial(_trunk_heads_kernel, depth_body, D),
            out_shape=jax.ShapeDtypeStruct((Bp, NP), jnp.float32),
            grid=(Bp // TB,),
            in_specs=[
                pl.BlockSpec((TB, 1), lambda i: (i, 0)),          # t: streamed per block
                pl.BlockSpec(packa.shape, lambda i: (0, 0)),      # trunk weights: resident
                pl.BlockSpec(packb.shape, lambda i: (0, 0)),      # head weights: resident
            ],
            out_specs=pl.BlockSpec((TB, NP), lambda i: (i, 0)),
            compiler_params=pltpu.CompilerParams(
                dimension_semantics=("parallel",)),               # split batch across TCs (v7x)
        )(t_pad, packa, packb)

        # Drop pad rows / pad lanes and expose head n as out[:, n, :].
        return out[:B, :N * F].reshape(B, N, F)

    return forward


def reference_forward(t, params):
    """Pure-JAX reference matching the PyTorch forward exactly (unfolded heads)."""
    hi = jax.lax.Precision.HIGHEST
    x = jnp.tanh(jnp.dot(t, params["w1"], precision=hi) + params["b1"])
    for m in range(params["w2"].shape[0]):
        x = jnp.tanh(jnp.dot(x, params["w2"][m], precision=hi) + params["b2"][m])
    outs = {}
    for n in range(params["wa"].shape[0]):
        xa = jnp.dot(x, params["wa"][n], precision=hi) + params["ba"][n]
        outs[n] = jnp.dot(xa, params["wo"][n], precision=hi) + params["bo"][n]
    return outs


def init_params(key, number_dims, number_dims_heads, depth_body, N):
    """Deterministic init mimicking PyTorch nn.Linear default U(-1/sqrt(fan_in), +)."""
    def linear(k, fan_in, fan_out):
        kw, kb = jax.random.split(k)
        bound = 1.0 / math.sqrt(fan_in)
        w = jax.random.uniform(kw, (fan_in, fan_out), jnp.float32, -bound, bound)
        b = jax.random.uniform(kb, (1, fan_out), jnp.float32, -bound, bound)
        return w, b

    keys = jax.random.split(key, 1 + depth_body + 2 * N)
    ki = iter(keys)

    w1, b1 = linear(next(ki), 1, number_dims)

    w2s, b2s = [], []
    for _ in range(depth_body):
        w, b = linear(next(ki), number_dims, number_dims)
        w2s.append(w); b2s.append(b)
    w2 = jnp.stack(w2s)                       # (depth, D, D)
    b2 = jnp.stack(b2s)                       # (depth, 1, D)

    was, bas = [], []
    for _ in range(N):
        w, b = linear(next(ki), number_dims, number_dims_heads)
        was.append(w); bas.append(b)
    wa = jnp.stack(was)                       # (N, D, H)
    ba = jnp.stack(bas)                       # (N, 1, H)

    wos, bos = [], []
    for _ in range(N):
        w, b = linear(next(ki), number_dims_heads, 4)
        wos.append(w); bos.append(b)
    wo = jnp.stack(wos)                       # (N, H, 4)
    bo = jnp.stack(bos)                       # (N, 1, 4)

    return {"w1": w1, "b1": b1, "w2": w2, "b2": b2,
            "wa": wa, "ba": ba, "wo": wo, "bo": bo}


if __name__ == "__main__":
    # Small shapes consistent with the module: t is (batch, 1); 20 heads.
    B = 8
    number_dims = 32
    number_dims_heads = 32
    depth_body = 6
    N = 20

    key = jax.random.PRNGKey(0)
    kp, kt = jax.random.split(key)
    params = init_params(kp, number_dims, number_dims_heads, depth_body, N)
    t = jax.random.uniform(kt, (B, 1), jnp.float32)

    # One-time parameter prep (hoisted out of the per-call path).
    packa, packb, meta = prepare_params(params)
    packa = jax.block_until_ready(packa)
    packb = jax.block_until_ready(packb)

    forward = make_forward_fn(meta)
    out = forward(t, packa, packb)            # (B, N, 4); head n = out[:, n, :]
    out = jax.block_until_ready(out)

    ref = reference_forward(t, params)
    assert out.shape == (B, N, 4)
    for n in range(N):
        if not jnp.allclose(out[:, n, :], ref[n], atol=1e-5, rtol=1e-5):
            raise AssertionError(f"head {n} mismatch")

    print("KERNEL_OK")
</pallas_src>

<mosaic_0001>
module attributes {stable_mosaic.version = 11 : i64} {
  func.func @_trunk_heads_kernel(%arg0: i32, %arg1: memref<8x1xf32, #tpu.memory_space<vmem>>, %arg2: memref<200x32xf32, #tpu.memory_space<vmem>>, %arg3: memref<33x128xf32, #tpu.memory_space<vmem>>, %arg4: memref<8x128xf32, #tpu.memory_space<vmem>>) attributes {dimension_semantics = [#tpu.dimension_semantics<parallel>], iteration_bounds = array<i64: 1>, scalar_prefetch = 0 : i64, scratch_operands = 0 : i64, tpu.core_type = #tpu.core_type<tc>, window_params = [{transform_indices = @transform_0, window_bounds = array<i64: 8, 1>}, {pipeline_mode = #tpu.pipeline_mode<synchronous>, transform_indices = @transform_1, window_bounds = array<i64: 200, 32>}, {pipeline_mode = #tpu.pipeline_mode<synchronous>, transform_indices = @transform_2, window_bounds = array<i64: 33, 128>}, {transform_indices = @transform_3, window_bounds = array<i64: 8, 128>}]} {
    %c0 = arith.constant 0 : index
    %c0_0 = arith.constant 0 : index
    %0 = vector.load %arg2[%c0, %c0_0] : memref<200x32xf32, #tpu.memory_space<vmem>>, vector<1x32xf32>
    %c1 = arith.constant 1 : index
    %c0_1 = arith.constant 0 : index
    %1 = vector.load %arg2[%c1, %c0_1] : memref<200x32xf32, #tpu.memory_space<vmem>>, vector<1x32xf32>
    %c0_2 = arith.constant 0 : index
    %c0_3 = arith.constant 0 : index
    %2 = vector.load %arg1[%c0_2, %c0_3] : memref<8x1xf32, #tpu.memory_space<vmem>>, vector<8x1xf32>
    %3 = vector.broadcast %2 : vector<8x1xf32> to vector<8x32xf32>
    %4 = vector.broadcast %0 : vector<1x32xf32> to vector<8x32xf32>
    %5 = arith.mulf %3, %4 : vector<8x32xf32>
    %6 = vector.broadcast %1 : vector<1x32xf32> to vector<8x32xf32>
    %7 = arith.addf %5, %6 : vector<8x32xf32>
    %8 = math.tanh %7 : vector<8x32xf32>
    %c8 = arith.constant 8 : index
    %c0_4 = arith.constant 0 : index
    %9 = vector.load %arg2[%c8, %c0_4] : memref<200x32xf32, #tpu.memory_space<vmem>>, vector<32x32xf32>
    %c2 = arith.constant 2 : index
    %c0_5 = arith.constant 0 : index
    %10 = vector.load %arg2[%c2, %c0_5] : memref<200x32xf32, #tpu.memory_space<vmem>>, vector<1x32xf32>
    %cst = arith.constant dense<0.000000e+00> : vector<8x32xf32>
    %11 = tpu.matmul %8, %9, %cst {dimension_numbers = #tpu.dot_dimension_numbers<[1], [0], [0], [1], [0, 0, 1, 1], [], []>, precision = #tpu.contract_precision<fp32>} : vector<8x32xf32>, vector<32x32xf32>, vector<8x32xf32> -> vector<8x32xf32>
    %12 = vector.broadcast %10 : vector<1x32xf32> to vector<8x32xf32>
    %13 = arith.addf %11, %12 : vector<8x32xf32>
    %14 = math.tanh %13 : vector<8x32xf32>
    %c40 = arith.constant 40 : index
    %c0_6 = arith.constant 0 : index
    %15 = vector.load %arg2[%c40, %c0_6] : memref<200x32xf32, #tpu.memory_space<vmem>>, vector<32x32xf32>
    %c3 = arith.constant 3 : index
    %c0_7 = arith.constant 0 : index
    %16 = vector.load %arg2[%c3, %c0_7] : memref<200x32xf32, #tpu.memory_space<vmem>>, vector<1x32xf32>
    %cst_8 = arith.constant dense<0.000000e+00> : vector<8x32xf32>
    %17 = tpu.matmul %14, %15, %cst_8 {dimension_numbers = #tpu.dot_dimension_numbers<[1], [0], [0], [1], [0, 0, 1, 1], [], []>, precision = #tpu.contract_precision<fp32>} : vector<8x32xf32>, vector<32x32xf32>, vector<8x32xf32> -> vector<8x32xf32>
    %18 = vector.broadcast %16 : vector<1x32xf32> to vector<8x32xf32>
    %19 = arith.addf %17, %18 : vector<8x32xf32>
    %20 = math.tanh %19 : vector<8x32xf32>
    %c72 = arith.constant 72 : index
    %c0_9 = arith.constant 0 : index
    %21 = vector.load %arg2[%c72, %c0_9] : memref<200x32xf32, #tpu.memory_space<vmem>>, vector<32x32xf32>
    %c4 = arith.constant 4 : index
    %c0_10 = arith.constant 0 : index
    %22 = vector.load %arg2[%c4, %c0_10] : memref<200x32xf32, #tpu.memory_space<vmem>>, vector<1x32xf32>
    %cst_11 = arith.constant dense<0.000000e+00> : vector<8x32xf32>
    %23 = tpu.matmul %20, %21, %cst_11 {dimension_numbers = #tpu.dot_dimension_numbers<[1], [0], [0], [1], [0, 0, 1, 1], [], []>, precision = #tpu.contract_precision<fp32>} : vector<8x32xf32>, vector<32x32xf32>, vector<8x32xf32> -> vector<8x32xf32>
    %24 = vector.broadcast %22 : vector<1x32xf32> to vector<8x32xf32>
    %25 = arith.addf %23, %24 : vector<8x32xf32>
    %26 = math.tanh %25 : vector<8x32xf32>
    %c104 = arith.constant 104 : index
    %c0_12 = arith.constant 0 : index
    %27 = vector.load %arg2[%c104, %c0_12] : memref<200x32xf32, #tpu.memory_space<vmem>>, vector<32x32xf32>
    %c5 = arith.constant 5 : index
    %c0_13 = arith.constant 0 : index
    %28 = vector.load %arg2[%c5, %c0_13] : memref<200x32xf32, #tpu.memory_space<vmem>>, vector<1x32xf32>
    %cst_14 = arith.constant dense<0.000000e+00> : vector<8x32xf32>
    %29 = tpu.matmul %26, %27, %cst_14 {dimension_numbers = #tpu.dot_dimension_numbers<[1], [0], [0], [1], [0, 0, 1, 1], [], []>, precision = #tpu.contract_precision<fp32>} : vector<8x32xf32>, vector<32x32xf32>, vector<8x32xf32> -> vector<8x32xf32>
    %30 = vector.broadcast %28 : vector<1x32xf32> to vector<8x32xf32>
    %31 = arith.addf %29, %30 : vector<8x32xf32>
    %32 = math.tanh %31 : vector<8x32xf32>
    %c136 = arith.constant 136 : index
    %c0_15 = arith.constant 0 : index
    %33 = vector.load %arg2[%c136, %c0_15] : memref<200x32xf32, #tpu.memory_space<vmem>>, vector<32x32xf32>
    %c6 = arith.constant 6 : index
    %c0_16 = arith.constant 0 : index
    %34 = vector.load %arg2[%c6, %c0_16] : memref<200x32xf32, #tpu.memory_space<vmem>>, vector<1x32xf32>
    %cst_17 = arith.constant dense<0.000000e+00> : vector<8x32xf32>
    %35 = tpu.matmul %32, %33, %cst_17 {dimension_numbers = #tpu.dot_dimension_numbers<[1], [0], [0], [1], [0, 0, 1, 1], [], []>, precision = #tpu.contract_precision<fp32>} : vector<8x32xf32>, vector<32x32xf32>, vector<8x32xf32> -> vector<8x32xf32>
    %36 = vector.broadcast %34 : vector<1x32xf32> to vector<8x32xf32>
    %37 = arith.addf %35, %36 : vector<8x32xf32>
    %38 = math.tanh %37 : vector<8x32xf32>
    %c168 = arith.constant 168 : index
    %c0_18 = arith.constant 0 : index
    %39 = vector.load %arg2[%c168, %c0_18] : memref<200x32xf32, #tpu.memory_space<vmem>>, vector<32x32xf32>
    %c7 = arith.constant 7 : index
    %c0_19 = arith.constant 0 : index
    %40 = vector.load %arg2[%c7, %c0_19] : memref<200x32xf32, #tpu.memory_space<vmem>>, vector<1x32xf32>
    %cst_20 = arith.constant dense<0.000000e+00> : vector<8x32xf32>
    %41 = tpu.matmul %38, %39, %cst_20 {dimension_numbers = #tpu.dot_dimension_numbers<[1], [0], [0], [1], [0, 0, 1, 1], [], []>, precision = #tpu.contract_precision<fp32>} : vector<8x32xf32>, vector<32x32xf32>, vector<8x32xf32> -> vector<8x32xf32>
    %42 = vector.broadcast %40 : vector<1x32xf32> to vector<8x32xf32>
    %43 = arith.addf %41, %42 : vector<8x32xf32>
    %44 = math.tanh %43 : vector<8x32xf32>
    %c0_21 = arith.constant 0 : index
    %c0_22 = arith.constant 0 : index
    %45 = vector.load %arg3[%c0_21, %c0_22] : memref<33x128xf32, #tpu.memory_space<vmem>>, vector<32x128xf32>
    %c32 = arith.constant 32 : index
    %c0_23 = arith.constant 0 : index
    %46 = vector.load %arg3[%c32, %c0_23] : memref<33x128xf32, #tpu.memory_space<vmem>>, vector<1x128xf32>
    %cst_24 = arith.constant dense<0.000000e+00> : vector<8x128xf32>
    %47 = tpu.matmul %44, %45, %cst_24 {dimension_numbers = #tpu.dot_dimension_numbers<[1], [0], [0], [1], [0, 0, 1, 1], [], []>, precision = #tpu.contract_precision<fp32>} : vector<8x32xf32>, vector<32x128xf32>, vector<8x128xf32> -> vector<8x128xf32>
    %48 = vector.broadcast %46 : vector<1x128xf32> to vector<8x128xf32>
    %49 = arith.addf %47, %48 : vector<8x128xf32>
    %c0_25 = arith.constant 0 : index
    %c0_26 = arith.constant 0 : index
    %50 = vector.load %arg4[%c0_25, %c0_26] : memref<8x128xf32, #tpu.memory_space<vmem>>, vector<8x128xf32>
    tpu.vector_store %arg4[%c0_25, %c0_26], %49 {strides = array<i32>} : memref<8x128xf32, #tpu.memory_space<vmem>>, vector<8x128xf32>,
    return
  }
  func.func @transform_0(%arg0: i32) -> (i32, i32) {
    %c0_i32 = arith.constant 0 : i32
    %c0_i32_0 = arith.constant 0 : i32
    return %arg0, %c0_i32 : i32, i32
  }
  func.func @transform_1(%arg0: i32) -> (i32, i32) {
    %c0_i32 = arith.constant 0 : i32
    %c0_i32_0 = arith.constant 0 : i32
    %c0_i32_1 = arith.constant 0 : i32
    return %c0_i32, %c0_i32_0 : i32, i32
  }
  func.func @transform_2(%arg0: i32) -> (i32, i32) {
    %c0_i32 = arith.constant 0 : i32
    %c0_i32_0 = arith.constant 0 : i32
    %c0_i32_1 = arith.constant 0 : i32
    return %c0_i32, %c0_i32_0 : i32, i32
  }
  func.func @transform_3(%arg0: i32) -> (i32, i32) {
    %c0_i32 = arith.constant 0 : i32
    %c0_i32_0 = arith.constant 0 : i32
    return %arg0, %c0_i32 : i32, i32
  }
}

</mosaic_0001>

<bundles_post_ra>
// kernel: forward.1
= control target key start
LH: loop header
LB: loop body
LE: loop exit
PB: predicated region body
PF: predicated region fallthrough
CT: control target
= control target key end

     0   :  { %v4223_v0 = vmov 0   ;;  %v4224_v5 = vmov 0.0   ;;  %vm4225_vm0 = vmmov 0   ;;  %vm42_vm1 = vcmask 261120   ;;  %s5042_s0 = inlined_call_operand.vmem [shape: f32[8,1], index: 0, kind: input, shape index: {}]   ;;  %s5043_s1 = inlined_call_operand.vmem [shape: f32[200,32], index: 1, kind: input, shape index: {}]   ;;  %s5044_s2 = inlined_call_operand.vmem [shape: f32[33,128], index: 2, kind: input, shape index: {}]   ;;  %s5045_s3 = inlined_call_operand.vmem [shape: f32[8,128], index: 3, kind: output, shape index: {}]  }
   0x1   :  { %4208 = vset.pattern.permute.xlu0 %v4223_v0  ;;  %v16_v1 = vld [vmem:[%s5042_s0] sm:$0xff]  ;;  %v35_v3 = vld [vmem:[%s5043_s1 + $0x18] sm:$0xff]  ;;  %v34_v4 = vld [vmem:[%s5043_s1 + $0x10] sm:$0xff]  ;;  %3754 = vmatprep.subr.mxu1 %v4224_v5 }
   0x2   :  { %19 = vperm.xlu0 %4208, %v16_v1   ;;  %v36_v2 = vld [vmem:[%s5043_s1 + $0x20] sm:$0xff]  ;;  %v4261_v7 = vand.u32 4294901760, %v35_v3  ;;  %v4263_v8 = vand.u32 4294901760, %v34_v4  ;;  %v33_v9 = vld [vmem:[%s5043_s1 + $0x8] sm:$0xff]  ;;  %3743 = vmatprep.subr.mxu0 %v4224_v5  ;;  %v534_v41 = vld [vmem:[%s5043_s1 + $0x38] sm:$0xff] }
   0x3   :  { %v4259_v6 = vand.u32 4294901760, %v36_v2  ;;  %v4269_v10 = vand.u32 4294901760, %v33_v9  ;;  %3762 = vmatprep.mubr.msk.f32.mxu1 %vm4225_vm0, %v4224_v5  ;;  %3751 = vmatprep.mubr.msk.f32.mxu0 %vm4225_vm0, %v4224_v5  ;;  %v3524_v27 = vld [vmem:[%s5043_s1] ss:$0 sm:$0xff]  ;;  %v3525_v28 = vld [vmem:[%s5043_s1 + $0x1] ss:$0 sm:$0xff] }
   0x4   :  { %v4279_v12 = vsub.f32 %v35_v3, %v4261_v7  ;;  %v4282_v13 = vsub.f32 %v34_v4, %v4263_v8  ;;  %v535_v39 = vld [vmem:[%s5043_s1 + $0x40] sm:$0xff]  ;;  %v533_v42 = vld [vmem:[%s5043_s1 + $0x30] sm:$0xff]  ;;  %v532_v43 = vld [vmem:[%s5043_s1 + $0x28] sm:$0xff]  ;;  %v4387_v45 = vand.u32 4294901760, %v534_v41 }
   0x5   :  { %v4276_v11 = vsub.f32 %v36_v2, %v4259_v6  ;;  %3744 = vmatpush3.msra.mxu0 %v4259_v6  ;;  %v4286_v14 = vsub.f32 %v33_v9, %v4269_v10  ;;  %v4373_v40 = vand.u32 4294901760, %v535_v39  ;;  %v4389_v46 = vand.u32 4294901760, %v533_v42 }
   0x6   :  { %3745 = vmatprep.subr.mxu0 %v4224_v5  ;;  %v159_v16 = vand.u32 4294901760, %v4279_v12  ;;  %v166_v17 = vand.u32 4294901760, %v4282_v13  ;;  %v4391_v47 = vand.u32 4294901760, %v532_v43  ;;  %v4397_v49 = vsub.f32 %v534_v41, %v4387_v45 }
   0x7   :  { %v152_v15 = vand.u32 4294901760, %v4276_v11  ;;  %3746 = vmatpush3.msra.mxu0 %v4261_v7  ;;  %v173_v18 = vand.u32 4294901760, %v4286_v14  ;;  %v4385_v44 = vsub.f32 %v535_v39, %v4373_v40  ;;  %v4400_v50 = vsub.f32 %v533_v42, %v4389_v46 }
   0x8   :  { %3747 = vmatprep.subr.mxu0 %v4224_v5  ;;  %v160_v20 = vsub.f32 %v4279_v12, %v159_v16  ;;  %v167_v21 = vsub.f32 %v4282_v13, %v166_v17  ;;  %v4403_v51 = vsub.f32 %v532_v43, %v4391_v47  ;;  %v657_v53 = vand.u32 4294901760, %v4397_v49 }
   0x9   :  { %v153_v19 = vsub.f32 %v4276_v11, %v152_v15  ;;  %3748 = vmatpush3.msra.mxu0 %v4263_v8  ;;  %v174_v24 = vsub.f32 %v4286_v14, %v173_v18  ;;  %v650_v48 = vand.u32 4294901760, %v4385_v44  ;;  %v664_v54 = vand.u32 4294901760, %v4400_v50 }
   0xa   :  { %3749 = vmatprep.subr.mxu0 %v4224_v5  ;;  %v161_v23 = vand.u32 4294901760, %v160_v20  ;;  %v168_v25 = vand.u32 4294901760, %v167_v21  ;;  %v671_v55 = vand.u32 4294901760, %v4403_v51  ;;  %v658_v57 = vsub.f32 %v4397_v49, %v657_v53 }
   0xb   :  { %v154_v22 = vand.u32 4294901760, %v153_v19  ;;  %3750 = vmatpush3.msra.mxu0 %v4269_v10  ;;  %v175_v26 = vand.u32 4294901760, %v174_v24  ;;  %v651_v52 = vsub.f32 %v4385_v44, %v650_v48  ;;  %v665_v58 = vsub.f32 %v4400_v50, %v664_v54 }
   0xc   :  { %3765 = vmatprep.subr.mxu0 %v4224_v5  ;;  %v672_v59 = vsub.f32 %v4403_v51, %v671_v55  ;;  %v659_v60 = vand.u32 4294901760, %v658_v57 }
   0xd   :  { %3755 = vmatpush3.msra.mxu1 %v154_v22  ;;  %v652_v56 = vand.u32 4294901760, %v651_v52  ;;  %v666_v61 = vand.u32 4294901760, %v665_v58 }
   0xe   :  { %3756 = vmatprep.subr.mxu1 %v4224_v5  ;;  %v673_v62 = vand.u32 4294901760, %v672_v59 }
   0xf   :  { %3757 = vmatpush3.msra.mxu1 %v161_v23 }
  0x10   :  { %3758 = vmatprep.subr.mxu1 %v4224_v5 }
  0x11   :  { %3759 = vmatpush3.msra.mxu1 %v168_v25 }
  0x12   :  { %3760 = vmatprep.subr.mxu1 %v4224_v5 }
  0x13   :  { %3761 = vmatpush3.msra.mxu1 %v175_v26  ;;  %v1033_v26 = vld [vmem:[%s5043_s1 + $0x60] sm:$0xff] }
  0x14   :  { %3776 = vmatprep.subr.mxu1 %v4224_v5 }
  0x7d   :  { %v20_v29 = vpop.permute.xlu0 %19 }
  0x7e   :  { %v26_v30 = vmul.f32 %v3524_v27, %v20_v29  ;;  %v4485_v27 = vand.u32 4294901760, %v1033_v26  ;;  %v1031_v29 = vld [vmem:[%s5043_s1 + $0x50] sm:$0xff] }
  0x80   :  { %v31_v31 = vadd.f32 %v3525_v28, %v26_v30  ;;  %v1032_v28 = vld [vmem:[%s5043_s1 + $0x58] sm:$0xff]  ;;  %v1030_v30 = vld [vmem:[%s5043_s1 + $0x48] sm:$0xff] }
  0x82   :  { %4209 = vtanh.f32 %v31_v31  ;;  %v4497_v31 = vsub.f32 %v1033_v26, %v4485_v27 }
  0x8f   :  { %v4210_v32 = vpop.eup %4209 }
  0x90   :  { %v44_v33 = vsel %vm42_vm1, %v4210_v32, 0  ;;  %v4499_v32 = vand.u32 4294901760, %v1032_v28 }
  0x91   :  { %v115_v34 = vand.u32 4294901760, %v44_v33 }
  0x93   :  { %v116_v35 = vsub.f32 %v44_v33, %v115_v34  ;;  %3763 = vmatmul.mubr.f32.vlgmr.msra.gmra.mxu1 %v115_v34  ;;  %v4501_v33 = vand.u32 4294901760, %v1031_v29 }
  0x94   :  { %3777 = vmatpush3.msra.mxu1 %v4259_v6  ;;  %3784 = vmatprep.mubr.msk.f32.mxu1 %vm4225_vm0, %v4224_v5 }
  0x95   :  { %3778 = vmatprep.subr.mxu1 %v4224_v5  ;;  %v117_v36 = vand.u32 4294901760, %v116_v35 }
  0x96   :  { %3779 = vmatpush3.msra.mxu1 %v4261_v7 }
  0x97   :  { %3780 = vmatprep.subr.mxu1 %v4224_v5  ;;  %v118_v37 = vsub.f32 %v116_v35, %v117_v36 }
  0x98   :  { %3781 = vmatpush3.msra.mxu1 %v4263_v8 }
  0x99   :  { %3782 = vmatprep.subr.mxu1 %v4224_v5  ;;  %v119_v38 = vand.u32 4294901760, %v118_v37  ;;  %v4512_v37 = vsub.f32 %v1031_v29, %v4501_v33 }
  0x9a   :  { %3783 = vmatpush3.msra.mxu1 %v4269_v10 }
  0x9b   :  { %3785 = vmatmul.mubr.f32.vlgmr.msra.gmra.mxu1 %v117_v36  ;;  %3798 = vmatprep.subr.mxu1 %v4224_v5  ;;  %v4509_v36 = vsub.f32 %v1032_v28, %v4499_v32  ;;  %v1162_v41 = vand.u32 4294901760, %v4512_v37 }
  0x9c   :  { %3752 = vmatmul.mubr.f32.vlgmr.msra.gmra.mxu0 %v119_v38  ;;  %3799 = vmatpush3.msra.mxu1 %v4259_v6  ;;  %v3526_v6 = vld [vmem:[%s5043_s1 + $0x2] ss:$0 sm:$0xff] }
  0x9d   :  { %3766 = vmatpush3.msra.mxu0 %v4276_v11  ;;  %3800 = vmatprep.subr.mxu1 %v4224_v5 }
  0x9e   :  { %3767 = vmatprep.subr.mxu0 %v4224_v5  ;;  %3801 = vmatpush3.msra.mxu1 %v4261_v7 }
  0x9f   :  { %3768 = vmatpush3.msra.mxu0 %v4279_v12  ;;  %3802 = vmatprep.subr.mxu1 %v4224_v5 }
  0xa0   :  { %3769 = vmatprep.subr.mxu0 %v4224_v5  ;;  %3803 = vmatpush3.msra.mxu1 %v4263_v8 }
  0xa1   :  { %3770 = vmatpush3.msra.mxu0 %v4282_v13  ;;  %3804 = vmatprep.subr.mxu1 %v4224_v5 }
  0xa2   :  { %3771 = vmatprep.subr.mxu0 %v4224_v5  ;;  %3773 = vmatprep.mubr.msk.f32.mxu0 %vm4225_vm0, %v4224_v5 }
  0xa3   :  { %3772 = vmatpush3.msra.mxu0 %v4286_v14  ;;  %3805 = vmatpush3.msra.mxu1 %v4269_v10 }
  0xa4   :  { %3806 = vmatprep.mubr.msk.f32.mxu1 %vm4225_vm0, %v4224_v5  ;;  %3774 = vmatmul.mubr.f32.vlgmr.msra.gmra.mxu0 %v116_v35  ;;  %v1148_v35 = vand.u32 4294901760, %v4497_v31 }
  0xa5   :  { %3787 = vmatprep.subr.mxu0 %v4224_v5  ;;  %3807 = vmatmul.mubr.f32.vlgmr.msra.gmra.mxu1 %v115_v34 }
  0xa6   :  { %3788 = vmatpush3.msra.mxu0 %v152_v15  ;;  %3795 = vmatprep.mubr.msk.f32.mxu0 %vm4225_vm0, %v4224_v5  ;;  %v1149_v39 = vsub.f32 %v4497_v31, %v1148_v35 }
  0xa7   :  { %3789 = vmatprep.subr.mxu0 %v4224_v5  ;;  %3820 = vmatprep.subr.mxu1 %v4224_v5 }
  0xa8   :  { %3790 = vmatpush3.msra.mxu0 %v159_v16  ;;  %3828 = vmatprep.mubr.msk.f32.mxu1 %vm4225_vm0, %v4224_v5  ;;  %v1150_v43 = vand.u32 4294901760, %v1149_v39 }
  0xa9   :  { %3791 = vmatprep.subr.mxu0 %v4224_v5  ;;  %3821 = vmatpush3.msra.mxu1 %v652_v56  ;;  %v3527_v56 = vld [vmem:[%s5043_s1 + $0x3] ss:$0 sm:$0xff] }
  0xaa   :  { %3792 = vmatpush3.msra.mxu0 %v166_v17  ;;  %3822 = vmatprep.subr.mxu1 %v4224_v5 }
  0xab   :  { %3793 = vmatprep.subr.mxu0 %v4224_v5  ;;  %3823 = vmatpush3.msra.mxu1 %v659_v60 }
  0xac   :  { %3794 = vmatpush3.msra.mxu0 %v173_v18  ;;  %3824 = vmatprep.subr.mxu1 %v4224_v5 }
  0xad   :  { %3796 = vmatmul.mubr.f32.vlgmr.msra.gmra.mxu0 %v115_v34  ;;  %3809 = vmatprep.subr.mxu0 %v4224_v5  ;;  %v4503_v34 = vand.u32 4294901760, %v1030_v30 }
  0xae   :  { %3817 = vmatprep.mubr.msk.f32.mxu0 %vm4225_vm0, %v4224_v5  ;;  %3810 = vmatpush3.msra.mxu0 %v4373_v40 }
  0xaf   :  { %3811 = vmatprep.subr.mxu0 %v4224_v5  ;;  %3825 = vmatpush3.msra.mxu1 %v666_v61  ;;  %v4515_v38 = vsub.f32 %v1030_v30, %v4503_v34 }
  0xb0   :  { %3812 = vmatpush3.msra.mxu0 %v4387_v45  ;;  %3826 = vmatprep.subr.mxu1 %v4224_v5 }
  0xb1   :  { %3813 = vmatprep.subr.mxu0 %v4224_v5  ;;  %3827 = vmatpush3.msra.mxu1 %v673_v62  ;;  %v1169_v42 = vand.u32 4294901760, %v4515_v38 }
  0xb2   :  { %3814 = vmatpush3.msra.mxu0 %v4389_v46  ;;  %3842 = vmatprep.subr.mxu1 %v4224_v5 }
  0xb3   :  { %3815 = vmatprep.subr.mxu0 %v4224_v5 }
  0xb4   :  { %3816 = vmatpush3.msra.mxu0 %v4391_v47 }
  0xb5   :  { %3831 = vmatprep.subr.mxu0 %v4224_v5 }
 0x153   :  { %v212_v63 = vpop.f32.mrf.mxu1 }
 0x155   :  { %v3764_v0 = vpop.f32.mrf.mxu1 }
 0x15b   :  { %v369_v1 = vpop.f32.mrf.mxu1 }
 0x15c   :  { %v121_v2 = vpop.f32.mrf.mxu0 }
 0x15d   :  { %v3786_v3 = vpop.f32.mrf.mxu1  ;;  %v122_v7 = vadd.f32 %v3526_v6, %v121_v2 }
 0x15e   :  { %v3753_v4 = vpop.f32.mrf.mxu0 }
 0x15f   :  { %v213_v10 = vadd.f32 %v212_v63, %v122_v7 }
 0x164   :  { %v292_v8 = vpop.f32.mrf.mxu0 }
 0x165   :  { %v527_v9 = vpop.f32.mrf.mxu1  ;;  %v293_v13 = vadd.f32 %v292_v8, %v213_v10 }
 0x166   :  { %v3775_v11 = vpop.f32.mrf.mxu0 }
 0x167   :  { %v3808_v12 = vpop.f32.mrf.mxu1  ;;  %v370_v14 = vadd.f32 %v369_v1, %v293_v13  ;;  %v1531_v13 = vld [vmem:[%s5043_s1 + $0x80] sm:$0xff] }
 0x16d   :  { %v452_v15 = vpop.f32.mrf.mxu0 }
 0x16e   :  { %v453_v16 = vadd.f32 %v452_v15, %v370_v14  ;;  %v4597_v14 = vand.u32 4294901760, %v1531_v13  ;;  %v1530_v15 = vld [vmem:[%s5043_s1 + $0x78] sm:$0xff] }
 0x16f   :  { %v3797_v17 = vpop.f32.mrf.mxu0 }
 0x170   :  { %v528_v18 = vadd.f32 %v527_v9, %v453_v16  ;;  %v1529_v16 = vld [vmem:[%s5043_s1 + $0x70] sm:$0xff]  ;;  %v1528_v17 = vld [vmem:[%s5043_s1 + $0x68] sm:$0xff] }
 0x172   :  { %4211 = vtanh.f32 %v528_v18  ;;  %v4609_v18 = vsub.f32 %v1531_v13, %v4597_v14 }
 0x17f   :  { %v4212_v19 = vpop.eup %4211 }
 0x180   :  { %v542_v20 = vsel %vm42_vm1, %v4212_v19, 0  ;;  %v4611_v19 = vand.u32 4294901760, %v1530_v15 }
 0x181   :  { %v613_v21 = vand.u32 4294901760, %v542_v20 }
 0x183   :  { %v614_v22 = vsub.f32 %v542_v20, %v613_v21  ;;  %3829 = vmatmul.mubr.f32.vlgmr.msra.gmra.mxu1 %v613_v21  ;;  %v4613_v20 = vand.u32 4294901760, %v1529_v16 }
 0x184   :  { %3843 = vmatpush3.msra.mxu1 %v4373_v40  ;;  %3850 = vmatprep.mubr.msk.f32.mxu1 %vm4225_vm0, %v4224_v5 }
 0x185   :  { %3844 = vmatprep.subr.mxu1 %v4224_v5  ;;  %v615_v23 = vand.u32 4294901760, %v614_v22 }
 0x186   :  { %3845 = vmatpush3.msra.mxu1 %v4387_v45 }
 0x187   :  { %3846 = vmatprep.subr.mxu1 %v4224_v5  ;;  %v616_v24 = vsub.f32 %v614_v22, %v615_v23 }
 0x188   :  { %3847 = vmatpush3.msra.mxu1 %v4389_v46 }
 0x189   :  { %3848 = vmatprep.subr.mxu1 %v4224_v5  ;;  %v617_v25 = vand.u32 4294901760, %v616_v24  ;;  %v4624_v24 = vsub.f32 %v1529_v16, %v4613_v20 }
 0x18a   :  { %3849 = vmatpush3.msra.mxu1 %v4391_v47 }
 0x18b   :  { %3851 = vmatmul.mubr.f32.vlgmr.msra.gmra.mxu1 %v615_v23  ;;  %3864 = vmatprep.subr.mxu1 %v4224_v5  ;;  %v4621_v23 = vsub.f32 %v1530_v15, %v4611_v19  ;;  %v1660_v28 = vand.u32 4294901760, %v4624_v24 }
 0x18c   :  { %3818 = vmatmul.mubr.f32.vlgmr.msra.gmra.mxu0 %v617_v25  ;;  %3865 = vmatpush3.msra.mxu1 %v4373_v40  ;;  %v1155_v40 = vand.u32 4294901760, %v4509_v36 }
 0x18d   :  { %3832 = vmatpush3.msra.mxu0 %v4385_v44  ;;  %3866 = vmatprep.subr.mxu1 %v4224_v5 }
 0x18e   :  { %3833 = vmatprep.subr.mxu0 %v4224_v5  ;;  %3867 = vmatpush3.msra.mxu1 %v4387_v45  ;;  %v1156_v44 = vsub.f32 %v4509_v36, %v1155_v40  ;;  %v1163_v45 = vsub.f32 %v4512_v37, %v1162_v41 }
 0x18f   :  { %3834 = vmatpush3.msra.mxu0 %v4397_v49  ;;  %3868 = vmatprep.subr.mxu1 %v4224_v5 }
 0x190   :  { %3835 = vmatprep.subr.mxu0 %v4224_v5  ;;  %3869 = vmatpush3.msra.mxu1 %v4389_v46  ;;  %v1170_v46 = vsub.f32 %v4515_v38, %v1169_v42 }
 0x191   :  { %3836 = vmatpush3.msra.mxu0 %v4400_v50  ;;  %3870 = vmatprep.subr.mxu1 %v4224_v5 }
 0x192   :  { %3837 = vmatprep.subr.mxu0 %v4224_v5  ;;  %3839 = vmatprep.mubr.msk.f32.mxu0 %vm4225_vm0, %v4224_v5  ;;  %v1171_v49 = vand.u32 4294901760, %v1170_v46 }
 0x193   :  { %3838 = vmatpush3.msra.mxu0 %v4403_v51  ;;  %3871 = vmatpush3.msra.mxu1 %v4391_v47  ;;  %v1157_v47 = vand.u32 4294901760, %v1156_v44 }
 0x194   :  { %3872 = vmatprep.mubr.msk.f32.mxu1 %vm4225_vm0, %v4224_v5  ;;  %3840 = vmatmul.mubr.f32.vlgmr.msra.gmra.mxu0 %v614_v22  ;;  %v1646_v22 = vand.u32 4294901760, %v4609_v18 }
 0x195   :  { %3853 = vmatprep.subr.mxu0 %v4224_v5  ;;  %3873 = vmatmul.mubr.f32.vlgmr.msra.gmra.mxu1 %v613_v21 }
 0x196   :  { %3854 = vmatpush3.msra.mxu0 %v650_v48  ;;  %3861 = vmatprep.mubr.msk.f32.mxu0 %vm4225_vm0, %v4224_v5  ;;  %v1164_v48 = vand.u32 4294901760, %v1163_v45  ;;  %v1647_v26 = vsub.f32 %v4609_v18, %v1646_v22 }
 0x197   :  { %3855 = vmatprep.subr.mxu0 %v4224_v5  ;;  %3886 = vmatprep.subr.mxu1 %v4224_v5 }
 0x198   :  { %3856 = vmatpush3.msra.mxu0 %v657_v53  ;;  %3894 = vmatprep.mubr.msk.f32.mxu1 %vm4225_vm0, %v4224_v5  ;;  %v1648_v30 = vand.u32 4294901760, %v1647_v26 }
 0x199   :  { %3857 = vmatprep.subr.mxu0 %v4224_v5  ;;  %3887 = vmatpush3.msra.mxu1 %v1150_v43  ;;  %v3528_v43 = vld [vmem:[%s5043_s1 + $0x4] ss:$0 sm:$0xff] }
 0x19a   :  { %3858 = vmatpush3.msra.mxu0 %v664_v54  ;;  %3888 = vmatprep.subr.mxu1 %v4224_v5 }
 0x19b   :  { %3859 = vmatprep.subr.mxu0 %v4224_v5  ;;  %3889 = vmatpush3.msra.mxu1 %v1157_v47 }
 0x19c   :  { %3860 = vmatpush3.msra.mxu0 %v671_v55  ;;  %3890 = vmatprep.subr.mxu1 %v4224_v5 }
 0x19d   :  { %3862 = vmatmul.mubr.f32.vlgmr.msra.gmra.mxu0 %v613_v21  ;;  %3875 = vmatprep.subr.mxu0 %v4224_v5  ;;  %v4615_v21 = vand.u32 4294901760, %v1528_v17 }
 0x19e   :  { %3883 = vmatprep.mubr.msk.f32.mxu0 %vm4225_vm0, %v4224_v5  ;;  %3876 = vmatpush3.msra.mxu0 %v4485_v27 }
 0x19f   :  { %3877 = vmatprep.subr.mxu0 %v4224_v5  ;;  %3891 = vmatpush3.msra.mxu1 %v1164_v48  ;;  %v4627_v25 = vsub.f32 %v1528_v17, %v4615_v21 }
 0x1a0   :  { %3878 = vmatpush3.msra.mxu0 %v4499_v32  ;;  %3892 = vmatprep.subr.mxu1 %v4224_v5 }
 0x1a1   :  { %3879 = vmatprep.subr.mxu0 %v4224_v5  ;;  %3893 = vmatpush3.msra.mxu1 %v1171_v49  ;;  %v1667_v29 = vand.u32 4294901760, %v4627_v25 }
 0x1a2   :  { %3880 = vmatpush3.msra.mxu0 %v4501_v33  ;;  %3908 = vmatprep.subr.mxu1 %v4224_v5 }
 0x1a3   :  { %3881 = vmatprep.subr.mxu0 %v4224_v5 }
 0x1a4   :  { %3882 = vmatpush3.msra.mxu0 %v4503_v34 }
 0x1a5   :  { %3897 = vmatprep.subr.mxu0 %v4224_v5 }
 0x243   :  { %v710_v50 = vpop.f32.mrf.mxu1 }
 0x245   :  { %v3830_v51 = vpop.f32.mrf.mxu1 }
 0x24b   :  { %v867_v52 = vpop.f32.mrf.mxu1 }
 0x24c   :  { %v619_v53 = vpop.f32.mrf.mxu0 }
 0x24d   :  { %v3852_v54 = vpop.f32.mrf.mxu1  ;;  %v620_v57 = vadd.f32 %v3527_v56, %v619_v53 }
 0x24e   :  { %v3819_v55 = vpop.f32.mrf.mxu0 }
 0x24f   :  { %v711_v60 = vadd.f32 %v710_v50, %v620_v57 }
 0x254   :  { %v790_v58 = vpop.f32.mrf.mxu0 }
 0x255   :  { %v1025_v59 = vpop.f32.mrf.mxu1  ;;  %v791_v63 = vadd.f32 %v790_v58, %v711_v60 }
 0x256   :  { %v3841_v61 = vpop.f32.mrf.mxu0 }
 0x257   :  { %v3874_v62 = vpop.f32.mrf.mxu1  ;;  %v868_v0 = vadd.f32 %v867_v52, %v791_v63  ;;  %v2029_v63 = vld [vmem:[%s5043_s1 + $0xa0] sm:$0xff] }
 0x25d   :  { %v950_v1 = vpop.f32.mrf.mxu0 }
 0x25e   :  { %v951_v2 = vadd.f32 %v950_v1, %v868_v0  ;;  %v4709_v0 = vand.u32 4294901760, %v2029_v63  ;;  %v2028_v1 = vld [vmem:[%s5043_s1 + $0x98] sm:$0xff] }
 0x25f   :  { %v3863_v3 = vpop.f32.mrf.mxu0 }
 0x260   :  { %v1026_v4 = vadd.f32 %v1025_v59, %v951_v2  ;;  %v2027_v2 = vld [vmem:[%s5043_s1 + $0x90] sm:$0xff]  ;;  %v2026_v3 = vld [vmem:[%s5043_s1 + $0x88] sm:$0xff] }
 0x262   :  { %4213 = vtanh.f32 %v1026_v4  ;;  %v4721_v4 = vsub.f32 %v2029_v63, %v4709_v0 }
 0x26f   :  { %v4214_v6 = vpop.eup %4213 }
 0x270   :  { %v1040_v7 = vsel %vm42_vm1, %v4214_v6, 0  ;;  %v4723_v6 = vand.u32 4294901760, %v2028_v1 }
 0x271   :  { %v1111_v8 = vand.u32 4294901760, %v1040_v7 }
 0x273   :  { %v1112_v9 = vsub.f32 %v1040_v7, %v1111_v8  ;;  %3895 = vmatmul.mubr.f32.vlgmr.msra.gmra.mxu1 %v1111_v8  ;;  %v4725_v7 = vand.u32 4294901760, %v2027_v2 }
 0x274   :  { %3909 = vmatpush3.msra.mxu1 %v4485_v27  ;;  %3916 = vmatprep.mubr.msk.f32.mxu1 %vm4225_vm0, %v4224_v5 }
 0x275   :  { %3910 = vmatprep.subr.mxu1 %v4224_v5  ;;  %v1113_v10 = vand.u32 4294901760, %v1112_v9 }
 0x276   :  { %3911 = vmatpush3.msra.mxu1 %v4499_v32 }
 0x277   :  { %3912 = vmatprep.subr.mxu1 %v4224_v5  ;;  %v1114_v11 = vsub.f32 %v1112_v9, %v1113_v10 }
 0x278   :  { %3913 = vmatpush3.msra.mxu1 %v4501_v33 }
 0x279   :  { %3914 = vmatprep.subr.mxu1 %v4224_v5  ;;  %v1115_v12 = vand.u32 4294901760, %v1114_v11  ;;  %v4736_v11 = vsub.f32 %v2027_v2, %v4725_v7 }
 0x27a   :  { %3915 = vmatpush3.msra.mxu1 %v4503_v34 }
 0x27b   :  { %3917 = vmatmul.mubr.f32.vlgmr.msra.gmra.mxu1 %v1113_v10  ;;  %3930 = vmatprep.subr.mxu1 %v4224_v5  ;;  %v4733_v10 = vsub.f32 %v2028_v1, %v4723_v6  ;;  %v2158_v15 = vand.u32 4294901760, %v4736_v11 }
 0x27c   :  { %3884 = vmatmul.mubr.f32.vlgmr.msra.gmra.mxu0 %v1115_v12  ;;  %3931 = vmatpush3.msra.mxu1 %v4485_v27  ;;  %v1653_v27 = vand.u32 4294901760, %v4621_v23 }
 0x27d   :  { %3898 = vmatpush3.msra.mxu0 %v4497_v31  ;;  %3932 = vmatprep.subr.mxu1 %v4224_v5 }
 0x27e   :  { %3899 = vmatprep.subr.mxu0 %v4224_v5  ;;  %3933 = vmatpush3.msra.mxu1 %v4499_v32  ;;  %v1654_v31 = vsub.f32 %v4621_v23, %v1653_v27  ;;  %v1661_v32 = vsub.f32 %v4624_v24, %v1660_v28 }
 0x27f   :  { %3900 = vmatpush3.msra.mxu0 %v4509_v36  ;;  %3934 = vmatprep.subr.mxu1 %v4224_v5 }
 0x280   :  { %3901 = vmatprep.subr.mxu0 %v4224_v5  ;;  %3935 = vmatpush3.msra.mxu1 %v4501_v33  ;;  %v1668_v33 = vsub.f32 %v4627_v25, %v1667_v29 }
 0x281   :  { %3902 = vmatpush3.msra.mxu0 %v4512_v37  ;;  %3936 = vmatprep.subr.mxu1 %v4224_v5 }
 0x282   :  { %3903 = vmatprep.subr.mxu0 %v4224_v5  ;;  %3905 = vmatprep.mubr.msk.f32.mxu0 %vm4225_vm0, %v4224_v5  ;;  %v1669_v36 = vand.u32 4294901760, %v1668_v33 }
 0x283   :  { %3904 = vmatpush3.msra.mxu0 %v4515_v38  ;;  %3937 = vmatpush3.msra.mxu1 %v4503_v34  ;;  %v1655_v34 = vand.u32 4294901760, %v1654_v31 }
 0x284   :  { %3938 = vmatprep.mubr.msk.f32.mxu1 %vm4225_vm0, %v4224_v5  ;;  %3906 = vmatmul.mubr.f32.vlgmr.msra.gmra.mxu0 %v1112_v9  ;;  %v2144_v9 = vand.u32 4294901760, %v4721_v4 }
 0x285   :  { %3919 = vmatprep.subr.mxu0 %v4224_v5  ;;  %3939 = vmatmul.mubr.f32.vlgmr.msra.gmra.mxu1 %v1111_v8 }
 0x286   :  { %3920 = vmatpush3.msra.mxu0 %v1148_v35  ;;  %3927 = vmatprep.mubr.msk.f32.mxu0 %vm4225_vm0, %v4224_v5  ;;  %v1662_v35 = vand.u32 4294901760, %v1661_v32  ;;  %v2145_v13 = vsub.f32 %v4721_v4, %v2144_v9 }
 0x287   :  { %3921 = vmatprep.subr.mxu0 %v4224_v5  ;;  %3952 = vmatprep.subr.mxu1 %v4224_v5 }
 0x288   :  { %3922 = vmatpush3.msra.mxu0 %v1155_v40  ;;  %3960 = vmatprep.mubr.msk.f32.mxu1 %vm4225_vm0, %v4224_v5  ;;  %v2146_v17 = vand.u32 4294901760, %v2145_v13 }
 0x289   :  { %3923 = vmatprep.subr.mxu0 %v4224_v5  ;;  %3953 = vmatpush3.msra.mxu1 %v1648_v30  ;;  %v3529_v30 = vld [vmem:[%s5043_s1 + $0x5] ss:$0 sm:$0xff] }
 0x28a   :  { %3924 = vmatpush3.msra.mxu0 %v1162_v41  ;;  %3954 = vmatprep.subr.mxu1 %v4224_v5 }
 0x28b   :  { %3925 = vmatprep.subr.mxu0 %v4224_v5  ;;  %3955 = vmatpush3.msra.mxu1 %v1655_v34 }
 0x28c   :  { %3926 = vmatpush3.msra.mxu0 %v1169_v42  ;;  %3956 = vmatprep.subr.mxu1 %v4224_v5 }
 0x28d   :  { %3928 = vmatmul.mubr.f32.vlgmr.msra.gmra.mxu0 %v1111_v8  ;;  %3941 = vmatprep.subr.mxu0 %v4224_v5  ;;  %v4727_v8 = vand.u32 4294901760, %v2026_v3 }
 0x28e   :  { %3949 = vmatprep.mubr.msk.f32.mxu0 %vm4225_vm0, %v4224_v5  ;;  %3942 = vmatpush3.msra.mxu0 %v4597_v14 }
 0x28f   :  { %3943 = vmatprep.subr.mxu0 %v4224_v5  ;;  %3957 = vmatpush3.msra.mxu1 %v1662_v35  ;;  %v4739_v12 = vsub.f32 %v2026_v3, %v4727_v8 }
 0x290   :  { %3944 = vmatpush3.msra.mxu0 %v4611_v19  ;;  %3958 = vmatprep.subr.mxu1 %v4224_v5 }
 0x291   :  { %3945 = vmatprep.subr.mxu0 %v4224_v5  ;;  %3959 = vmatpush3.msra.mxu1 %v1669_v36  ;;  %v2165_v16 = vand.u32 4294901760, %v4739_v12 }
 0x292   :  { %3946 = vmatpush3.msra.mxu0 %v4613_v20  ;;  %3974 = vmatprep.subr.mxu1 %v4224_v5 }
 0x293   :  { %3947 = vmatprep.subr.mxu0 %v4224_v5 }
 0x294   :  { %3948 = vmatpush3.msra.mxu0 %v4615_v21 }
 0x295   :  { %3963 = vmatprep.subr.mxu0 %v4224_v5 }
 0x333   :  { %v1208_v37 = vpop.f32.mrf.mxu1 }
 0x335   :  { %v3896_v38 = vpop.f32.mrf.mxu1 }
 0x33b   :  { %v1365_v39 = vpop.f32.mrf.mxu1 }
 0x33c   :  { %v1117_v40 = vpop.f32.mrf.mxu0 }
 0x33d   :  { %v3918_v41 = vpop.f32.mrf.mxu1  ;;  %v1118_v44 = vadd.f32 %v3528_v43, %v1117_v40 }
 0x33e   :  { %v3885_v42 = vpop.f32.mrf.mxu0 }
 0x33f   :  { %v1209_v47 = vadd.f32 %v1208_v37, %v1118_v44 }
 0x344   :  { %v1288_v45 = vpop.f32.mrf.mxu0 }
 0x345   :  { %v1523_v46 = vpop.f32.mrf.mxu1  ;;  %v1289_v50 = vadd.f32 %v1288_v45, %v1209_v47 }
 0x346   :  { %v3907_v48 = vpop.f32.mrf.mxu0 }
 0x347   :  { %v3940_v49 = vpop.f32.mrf.mxu1  ;;  %v1366_v51 = vadd.f32 %v1365_v39, %v1289_v50  ;;  %v2527_v50 = vld [vmem:[%s5043_s1 + $0xc0] sm:$0xff] }
 0x34d   :  { %v1448_v52 = vpop.f32.mrf.mxu0 }
 0x34e   :  { %v1449_v53 = vadd.f32 %v1448_v52, %v1366_v51  ;;  %v4821_v51 = vand.u32 4294901760, %v2527_v50  ;;  %v2526_v52 = vld [vmem:[%s5043_s1 + $0xb8] sm:$0xff] }
 0x34f   :  { %v3929_v54 = vpop.f32.mrf.mxu0 }
 0x350   :  { %v1524_v55 = vadd.f32 %v1523_v46, %v1449_v53  ;;  %v2525_v53 = vld [vmem:[%s5043_s1 + $0xb0] sm:$0xff]  ;;  %v2524_v54 = vld [vmem:[%s5043_s1 + $0xa8] sm:$0xff] }
 0x352   :  { %4215 = vtanh.f32 %v1524_v55  ;;  %v4833_v55 = vsub.f32 %v2527_v50, %v4821_v51 }
 0x35f   :  { %v4216_v56 = vpop.eup %4215 }
 0x360   :  { %v1538_v57 = vsel %vm42_vm1, %v4216_v56, 0  ;;  %v4835_v56 = vand.u32 4294901760, %v2526_v52 }
 0x361   :  { %v1609_v58 = vand.u32 4294901760, %v1538_v57 }
 0x363   :  { %v1610_v59 = vsub.f32 %v1538_v57, %v1609_v58  ;;  %3961 = vmatmul.mubr.f32.vlgmr.msra.gmra.mxu1 %v1609_v58  ;;  %v4837_v57 = vand.u32 4294901760, %v2525_v53 }
 0x364   :  { %3975 = vmatpush3.msra.mxu1 %v4597_v14  ;;  %3982 = vmatprep.mubr.msk.f32.mxu1 %vm4225_vm0, %v4224_v5 }
 0x365   :  { %3976 = vmatprep.subr.mxu1 %v4224_v5  ;;  %v1611_v60 = vand.u32 4294901760, %v1610_v59 }
 0x366   :  { %3977 = vmatpush3.msra.mxu1 %v4611_v19 }
 0x367   :  { %3978 = vmatprep.subr.mxu1 %v4224_v5  ;;  %v1612_v61 = vsub.f32 %v1610_v59, %v1611_v60 }
 0x368   :  { %3979 = vmatpush3.msra.mxu1 %v4613_v20 }
 0x369   :  { %3980 = vmatprep.subr.mxu1 %v4224_v5  ;;  %v1613_v62 = vand.u32 4294901760, %v1612_v61  ;;  %v4848_v61 = vsub.f32 %v2525_v53, %v4837_v57 }
 0x36a   :  { %3981 = vmatpush3.msra.mxu1 %v4615_v21 }
 0x36b   :  { %3983 = vmatmul.mubr.f32.vlgmr.msra.gmra.mxu1 %v1611_v60  ;;  %3996 = vmatprep.subr.mxu1 %v4224_v5  ;;  %v4845_v60 = vsub.f32 %v2526_v52, %v4835_v56  ;;  %v2656_v1 = vand.u32 4294901760, %v4848_v61 }
 0x36c   :  { %3950 = vmatmul.mubr.f32.vlgmr.msra.gmra.mxu0 %v1613_v62  ;;  %3997 = vmatpush3.msra.mxu1 %v4597_v14  ;;  %v2151_v14 = vand.u32 4294901760, %v4733_v10 }
 0x36d   :  { %3964 = vmatpush3.msra.mxu0 %v4609_v18  ;;  %3998 = vmatprep.subr.mxu1 %v4224_v5 }
 0x36e   :  { %3965 = vmatprep.subr.mxu0 %v4224_v5  ;;  %3999 = vmatpush3.msra.mxu1 %v4611_v19  ;;  %v2152_v18 = vsub.f32 %v4733_v10, %v2151_v14  ;;  %v2159_v19 = vsub.f32 %v4736_v11, %v2158_v15 }
 0x36f   :  { %3966 = vmatpush3.msra.mxu0 %v4621_v23  ;;  %4000 = vmatprep.subr.mxu1 %v4224_v5 }
 0x370   :  { %3967 = vmatprep.subr.mxu0 %v4224_v5  ;;  %4001 = vmatpush3.msra.mxu1 %v4613_v20  ;;  %v2166_v20 = vsub.f32 %v4739_v12, %v2165_v16 }
 0x371   :  { %3968 = vmatpush3.msra.mxu0 %v4624_v24  ;;  %4002 = vmatprep.subr.mxu1 %v4224_v5 }
 0x372   :  { %3969 = vmatprep.subr.mxu0 %v4224_v5  ;;  %3971 = vmatprep.mubr.msk.f32.mxu0 %vm4225_vm0, %v4224_v5  ;;  %v2167_v23 = vand.u32 4294901760, %v2166_v20 }
 0x373   :  { %3970 = vmatpush3.msra.mxu0 %v4627_v25  ;;  %4003 = vmatpush3.msra.mxu1 %v4615_v21  ;;  %v2153_v21 = vand.u32 4294901760, %v2152_v18 }
 0x374   :  { %4004 = vmatprep.mubr.msk.f32.mxu1 %vm4225_vm0, %v4224_v5  ;;  %3972 = vmatmul.mubr.f32.vlgmr.msra.gmra.mxu0 %v1610_v59  ;;  %v2642_v59 = vand.u32 4294901760, %v4833_v55 }
 0x375   :  { %3985 = vmatprep.subr.mxu0 %v4224_v5  ;;  %4005 = vmatmul.mubr.f32.vlgmr.msra.gmra.mxu1 %v1609_v58 }
 0x376   :  { %3986 = vmatpush3.msra.mxu0 %v1646_v22  ;;  %3993 = vmatprep.mubr.msk.f32.mxu0 %vm4225_vm0, %v4224_v5  ;;  %v2160_v22 = vand.u32 4294901760, %v2159_v19  ;;  %v2643_v63 = vsub.f32 %v4833_v55, %v2642_v59 }
 0x377   :  { %3987 = vmatprep.subr.mxu0 %v4224_v5  ;;  %4018 = vmatprep.subr.mxu1 %v4224_v5 }
 0x378   :  { %3988 = vmatpush3.msra.mxu0 %v1653_v27  ;;  %4026 = vmatprep.mubr.msk.f32.mxu1 %vm4225_vm0, %v4224_v5  ;;  %v2644_v3 = vand.u32 4294901760, %v2643_v63 }
 0x379   :  { %3989 = vmatprep.subr.mxu0 %v4224_v5  ;;  %4019 = vmatpush3.msra.mxu1 %v2146_v17  ;;  %v3530_v17 = vld [vmem:[%s5043_s1 + $0x6] ss:$0 sm:$0xff] }
 0x37a   :  { %3990 = vmatpush3.msra.mxu0 %v1660_v28  ;;  %4020 = vmatprep.subr.mxu1 %v4224_v5 }
 0x37b   :  { %3991 = vmatprep.subr.mxu0 %v4224_v5  ;;  %4021 = vmatpush3.msra.mxu1 %v2153_v21 }
 0x37c   :  { %3992 = vmatpush3.msra.mxu0 %v1667_v29  ;;  %4022 = vmatprep.subr.mxu1 %v4224_v5 }
 0x37d   :  { %3994 = vmatmul.mubr.f32.vlgmr.msra.gmra.mxu0 %v1609_v58  ;;  %4007 = vmatprep.subr.mxu0 %v4224_v5  ;;  %v4839_v58 = vand.u32 4294901760, %v2524_v54 }
 0x37e   :  { %4015 = vmatprep.mubr.msk.f32.mxu0 %vm4225_vm0, %v4224_v5  ;;  %4008 = vmatpush3.msra.mxu0 %v4709_v0 }
 0x37f   :  { %4009 = vmatprep.subr.mxu0 %v4224_v5  ;;  %4023 = vmatpush3.msra.mxu1 %v2160_v22  ;;  %v4851_v62 = vsub.f32 %v2524_v54, %v4839_v58 }
 0x380   :  { %4010 = vmatpush3.msra.mxu0 %v4723_v6  ;;  %4024 = vmatprep.subr.mxu1 %v4224_v5 }
 0x381   :  { %4011 = vmatprep.subr.mxu0 %v4224_v5  ;;  %4025 = vmatpush3.msra.mxu1 %v2167_v23  ;;  %v2663_v2 = vand.u32 4294901760, %v4851_v62 }
 0x382   :  { %4012 = vmatpush3.msra.mxu0 %v4725_v7  ;;  %4040 = vmatprep.subr.mxu1 %v4224_v5 }
 0x383   :  { %4013 = vmatprep.subr.mxu0 %v4224_v5 }
 0x384   :  { %4014 = vmatpush3.msra.mxu0 %v4727_v8 }
 0x385   :  { %4029 = vmatprep.subr.mxu0 %v4224_v5 }
 0x423   :  { %v1706_v24 = vpop.f32.mrf.mxu1 }
 0x425   :  { %v3962_v25 = vpop.f32.mrf.mxu1 }
 0x42b   :  { %v1863_v26 = vpop.f32.mrf.mxu1 }
 0x42c   :  { %v1615_v27 = vpop.f32.mrf.mxu0 }
 0x42d   :  { %v3984_v28 = vpop.f32.mrf.mxu1  ;;  %v1616_v31 = vadd.f32 %v3529_v30, %v1615_v27 }
 0x42e   :  { %v3951_v29 = vpop.f32.mrf.mxu0 }
 0x42f   :  { %v1707_v34 = vadd.f32 %v1706_v24, %v1616_v31 }
 0x434   :  { %v1786_v32 = vpop.f32.mrf.mxu0 }
 0x435   :  { %v2021_v33 = vpop.f32.mrf.mxu1  ;;  %v1787_v37 = vadd.f32 %v1786_v32, %v1707_v34 }
 0x436   :  { %v3973_v35 = vpop.f32.mrf.mxu0 }
 0x437   :  { %v4006_v36 = vpop.f32.mrf.mxu1  ;;  %v1864_v38 = vadd.f32 %v1863_v26, %v1787_v37  ;;  %v3025_v37 = vld [vmem:[%s5044_s2 + $0x18] sm:$0xff] }
 0x43d   :  { %v1946_v39 = vpop.f32.mrf.mxu0 }
 0x43e   :  { %v1947_v40 = vadd.f32 %v1946_v39, %v1864_v38  ;;  %v4933_v38 = vand.u32 4294901760, %v3025_v37  ;;  %v3024_v39 = vld [vmem:[%s5044_s2 + $0x10] sm:$0xff] }
 0x43f   :  { %v3995_v41 = vpop.f32.mrf.mxu0 }
 0x440   :  { %v2022_v42 = vadd.f32 %v2021_v33, %v1947_v40  ;;  %v3023_v40 = vld [vmem:[%s5044_s2 + $0x8] sm:$0xff]  ;;  %v3022_v41 = vld [vmem:[%s5044_s2] sm:$0xff] }
 0x442   :  { %4217 = vtanh.f32 %v2022_v42  ;;  %v4945_v42 = vsub.f32 %v3025_v37, %v4933_v38 }
 0x44f   :  { %v4218_v43 = vpop.eup %4217 }
 0x450   :  { %v2036_v44 = vsel %vm42_vm1, %v4218_v43, 0  ;;  %v4947_v43 = vand.u32 4294901760, %v3024_v39 }
 0x451   :  { %v2107_v45 = vand.u32 4294901760, %v2036_v44 }
 0x453   :  { %v2108_v46 = vsub.f32 %v2036_v44, %v2107_v45  ;;  %4027 = vmatmul.mubr.f32.vlgmr.msra.gmra.mxu1 %v2107_v45  ;;  %v4949_v44 = vand.u32 4294901760, %v3023_v40 }
 0x454   :  { %4041 = vmatpush3.msra.mxu1 %v4709_v0  ;;  %4048 = vmatprep.mubr.msk.f32.mxu1 %vm4225_vm0, %v4224_v5 }
 0x455   :  { %4042 = vmatprep.subr.mxu1 %v4224_v5  ;;  %v2109_v47 = vand.u32 4294901760, %v2108_v46 }
 0x456   :  { %4043 = vmatpush3.msra.mxu1 %v4723_v6 }
 0x457   :  { %4044 = vmatprep.subr.mxu1 %v4224_v5  ;;  %v2110_v48 = vsub.f32 %v2108_v46, %v2109_v47 }
 0x458   :  { %4045 = vmatpush3.msra.mxu1 %v4725_v7 }
 0x459   :  { %4046 = vmatprep.subr.mxu1 %v4224_v5  ;;  %v2111_v49 = vand.u32 4294901760, %v2110_v48  ;;  %v4960_v48 = vsub.f32 %v3023_v40, %v4949_v44 }
 0x45a   :  { %4047 = vmatpush3.msra.mxu1 %v4727_v8 }
 0x45b   :  { %4049 = vmatmul.mubr.f32.vlgmr.msra.gmra.mxu1 %v2109_v47  ;;  %4062 = vmatprep.subr.mxu1 %v4224_v5  ;;  %v4957_v47 = vsub.f32 %v3024_v39, %v4947_v43  ;;  %v3154_v52 = vand.u32 4294901760, %v4960_v48 }
 0x45c   :  { %4016 = vmatmul.mubr.f32.vlgmr.msra.gmra.mxu0 %v2111_v49  ;;  %4063 = vmatpush3.msra.mxu1 %v4709_v0  ;;  %v2649_v0 = vand.u32 4294901760, %v4845_v60 }
 0x45d   :  { %4030 = vmatpush3.msra.mxu0 %v4721_v4  ;;  %4064 = vmatprep.subr.mxu1 %v4224_v5 }
 0x45e   :  { %4031 = vmatprep.subr.mxu0 %v4224_v5  ;;  %4065 = vmatpush3.msra.mxu1 %v4723_v6  ;;  %v2650_v4 = vsub.f32 %v4845_v60, %v2649_v0  ;;  %v2657_v6 = vsub.f32 %v4848_v61, %v2656_v1 }
 0x45f   :  { %4032 = vmatpush3.msra.mxu0 %v4733_v10  ;;  %4066 = vmatprep.subr.mxu1 %v4224_v5 }
 0x460   :  { %4033 = vmatprep.subr.mxu0 %v4224_v5  ;;  %4067 = vmatpush3.msra.mxu1 %v4725_v7  ;;  %v2664_v7 = vsub.f32 %v4851_v62, %v2663_v2 }
 0x461   :  { %4034 = vmatpush3.msra.mxu0 %v4736_v11  ;;  %4068 = vmatprep.subr.mxu1 %v4224_v5 }
 0x462   :  { %4035 = vmatprep.subr.mxu0 %v4224_v5  ;;  %4037 = vmatprep.mubr.msk.f32.mxu0 %vm4225_vm0, %v4224_v5  ;;  %v2665_v10 = vand.u32 4294901760, %v2664_v7 }
 0x463   :  { %4036 = vmatpush3.msra.mxu0 %v4739_v12  ;;  %4069 = vmatpush3.msra.mxu1 %v4727_v8  ;;  %v2651_v8 = vand.u32 4294901760, %v2650_v4 }
 0x464   :  { %4070 = vmatprep.mubr.msk.f32.mxu1 %vm4225_vm0, %v4224_v5  ;;  %4038 = vmatmul.mubr.f32.vlgmr.msra.gmra.mxu0 %v2108_v46  ;;  %v3140_v46 = vand.u32 4294901760, %v4945_v42 }
 0x465   :  { %4051 = vmatprep.subr.mxu0 %v4224_v5  ;;  %4071 = vmatmul.mubr.f32.vlgmr.msra.gmra.mxu1 %v2107_v45 }
 0x466   :  { %4052 = vmatpush3.msra.mxu0 %v2144_v9  ;;  %4059 = vmatprep.mubr.msk.f32.mxu0 %vm4225_vm0, %v4224_v5  ;;  %v2658_v9 = vand.u32 4294901760, %v2657_v6  ;;  %v3141_v50 = vsub.f32 %v4945_v42, %v3140_v46 }
 0x467   :  { %4053 = vmatprep.subr.mxu0 %v4224_v5  ;;  %4084 = vmatprep.subr.mxu1 %v4224_v5 }
 0x468   :  { %4054 = vmatpush3.msra.mxu0 %v2151_v14  ;;  %4092 = vmatprep.mubr.msk.f32.mxu1 %vm4225_vm0, %v4224_v5  ;;  %v3142_v54 = vand.u32 4294901760, %v3141_v50 }
 0x469   :  { %4055 = vmatprep.subr.mxu0 %v4224_v5  ;;  %4085 = vmatpush3.msra.mxu1 %v2644_v3  ;;  %v3531_v3 = vld [vmem:[%s5043_s1 + $0x7] ss:$0 sm:$0xff] }
 0x46a   :  { %4056 = vmatpush3.msra.mxu0 %v2158_v15  ;;  %4086 = vmatprep.subr.mxu1 %v4224_v5 }
 0x46b   :  { %4057 = vmatprep.subr.mxu0 %v4224_v5  ;;  %4087 = vmatpush3.msra.mxu1 %v2651_v8 }
 0x46c   :  { %4058 = vmatpush3.msra.mxu0 %v2165_v16  ;;  %4088 = vmatprep.subr.mxu1 %v4224_v5 }
 0x46d   :  { %4060 = vmatmul.mubr.f32.vlgmr.msra.gmra.mxu0 %v2107_v45  ;;  %4073 = vmatprep.subr.mxu0 %v4224_v5  ;;  %v4951_v45 = vand.u32 4294901760, %v3022_v41 }
 0x46e   :  { %4081 = vmatprep.mubr.msk.f32.mxu0 %vm4225_vm0, %v4224_v5  ;;  %4074 = vmatpush3.msra.mxu0 %v4821_v51 }
 0x46f   :  { %4075 = vmatprep.subr.mxu0 %v4224_v5  ;;  %4089 = vmatpush3.msra.mxu1 %v2658_v9  ;;  %v4963_v49 = vsub.f32 %v3022_v41, %v4951_v45 }
 0x470   :  { %4076 = vmatpush3.msra.mxu0 %v4835_v56  ;;  %4090 = vmatprep.subr.mxu1 %v4224_v5 }
 0x471   :  { %4077 = vmatprep.subr.mxu0 %v4224_v5  ;;  %4091 = vmatpush3.msra.mxu1 %v2665_v10  ;;  %v3161_v53 = vand.u32 4294901760, %v4963_v49 }
 0x472   :  { %4078 = vmatpush3.msra.mxu0 %v4837_v57  ;;  %4106 = vmatprep.subr.mxu1 %v4224_v5 }
 0x473   :  { %4079 = vmatprep.subr.mxu0 %v4224_v5 }
 0x474   :  { %4080 = vmatpush3.msra.mxu0 %v4839_v58 }
 0x475   :  { %4095 = vmatprep.subr.mxu0 %v4224_v5 }
 0x513   :  { %v2204_v11 = vpop.f32.mrf.mxu1 }
 0x515   :  { %v4028_v12 = vpop.f32.mrf.mxu1 }
 0x51b   :  { %v2361_v13 = vpop.f32.mrf.mxu1 }
 0x51c   :  { %v2113_v14 = vpop.f32.mrf.mxu0 }
 0x51d   :  { %v4050_v15 = vpop.f32.mrf.mxu1  ;;  %v2114_v18 = vadd.f32 %v3530_v17, %v2113_v14 }
 0x51e   :  { %v4017_v16 = vpop.f32.mrf.mxu0 }
 0x51f   :  { %v2205_v21 = vadd.f32 %v2204_v11, %v2114_v18 }
 0x524   :  { %v2284_v19 = vpop.f32.mrf.mxu0 }
 0x525   :  { %v2519_v20 = vpop.f32.mrf.mxu1  ;;  %v2285_v24 = vadd.f32 %v2284_v19, %v2205_v21 }
 0x526   :  { %v4039_v22 = vpop.f32.mrf.mxu0 }
 0x527   :  { %v4072_v23 = vpop.f32.mrf.mxu1  ;;  %v2362_v25 = vadd.f32 %v2361_v13, %v2285_v24 }
 0x52d   :  { %v2444_v26 = vpop.f32.mrf.mxu0 }
 0x52e   :  { %v2445_v27 = vadd.f32 %v2444_v26, %v2362_v25 }
 0x52f   :  { %v4061_v28 = vpop.f32.mrf.mxu0 }
 0x530   :  { %v2520_v29 = vadd.f32 %v2519_v20, %v2445_v27 }
 0x532   :  { %4219 = vtanh.f32 %v2520_v29 }
 0x53f   :  { %v4220_v30 = vpop.eup %4219 }
 0x540   :  { %v2534_v31 = vsel %vm42_vm1, %v4220_v30, 0  ;;  %v3532_v30 = vld [vmem:[%s5044_s2 + $0x20] ss:$0 sm:$0xff] }
 0x541   :  { %v2605_v32 = vand.u32 4294901760, %v2534_v31 }
 0x543   :  { %v2606_v33 = vsub.f32 %v2534_v31, %v2605_v32  ;;  %4093 = vmatmul.mubr.f32.vlgmr.msra.gmra.mxu1 %v2605_v32 }
 0x544   :  { %4107 = vmatpush3.msra.mxu1 %v4821_v51  ;;  %4114 = vmatprep.mubr.msk.f32.mxu1 %vm4225_vm0, %v4224_v5 }
 0x545   :  { %4108 = vmatprep.subr.mxu1 %v4224_v5  ;;  %v2607_v34 = vand.u32 4294901760, %v2606_v33 }
 0x546   :  { %4109 = vmatpush3.msra.mxu1 %v4835_v56 }
 0x547   :  { %4110 = vmatprep.subr.mxu1 %v4224_v5  ;;  %v2608_v35 = vsub.f32 %v2606_v33, %v2607_v34 }
 0x548   :  { %4111 = vmatpush3.msra.mxu1 %v4837_v57 }
 0x549   :  { %4112 = vmatprep.subr.mxu1 %v4224_v5  ;;  %v2609_v36 = vand.u32 4294901760, %v2608_v35 }
 0x54a   :  { %4113 = vmatpush3.msra.mxu1 %v4839_v58 }
 0x54b   :  { %4115 = vmatmul.mubr.f32.vlgmr.msra.gmra.mxu1 %v2607_v34  ;;  %4128 = vmatprep.subr.mxu1 %v4224_v5 }
 0x54c   :  { %4082 = vmatmul.mubr.f32.vlgmr.msra.gmra.mxu0 %v2609_v36  ;;  %4129 = vmatpush3.msra.mxu1 %v4821_v51  ;;  %v3147_v51 = vand.u32 4294901760, %v4957_v47 }
 0x54d   :  { %4096 = vmatpush3.msra.mxu0 %v4833_v55  ;;  %4130 = vmatprep.subr.mxu1 %v4224_v5 }
 0x54e   :  { %4097 = vmatprep.subr.mxu0 %v4224_v5  ;;  %4131 = vmatpush3.msra.mxu1 %v4835_v56  ;;  %v3148_v55 = vsub.f32 %v4957_v47, %v3147_v51  ;;  %v3155_v56 = vsub.f32 %v4960_v48, %v3154_v52 }
 0x54f   :  { %4098 = vmatpush3.msra.mxu0 %v4845_v60  ;;  %4132 = vmatprep.subr.mxu1 %v4224_v5 }
 0x550   :  { %4099 = vmatprep.subr.mxu0 %v4224_v5  ;;  %4133 = vmatpush3.msra.mxu1 %v4837_v57  ;;  %v3162_v57 = vsub.f32 %v4963_v49, %v3161_v53 }
 0x551   :  { %4100 = vmatpush3.msra.mxu0 %v4848_v61  ;;  %4134 = vmatprep.subr.mxu1 %v4224_v5 }
 0x552   :  { %4101 = vmatprep.subr.mxu0 %v4224_v5  ;;  %4103 = vmatprep.mubr.msk.f32.mxu0 %vm4225_vm0, %v4224_v5  ;;  %v3163_v60 = vand.u32 4294901760, %v3162_v57 }
 0x553   :  { %4102 = vmatpush3.msra.mxu0 %v4851_v62  ;;  %4135 = vmatpush3.msra.mxu1 %v4839_v58  ;;  %v3149_v58 = vand.u32 4294901760, %v3148_v55 }
 0x554   :  { %4136 = vmatprep.mubr.msk.f32.mxu1 %vm4225_vm0, %v4224_v5  ;;  %4104 = vmatmul.mubr.f32.vlgmr.msra.gmra.mxu0 %v2606_v33 }
 0x555   :  { %4117 = vmatprep.subr.mxu0 %v4224_v5  ;;  %4137 = vmatmul.mubr.f32.vlgmr.msra.gmra.mxu1 %v2605_v32 }
 0x556   :  { %4118 = vmatpush3.msra.mxu0 %v2642_v59  ;;  %4125 = vmatprep.mubr.msk.f32.mxu0 %vm4225_vm0, %v4224_v5  ;;  %v3156_v59 = vand.u32 4294901760, %v3155_v56 }
 0x557   :  { %4119 = vmatprep.subr.mxu0 %v4224_v5  ;;  %4150 = vmatprep.subr.mxu1 %v4224_v5 }
 0x558   :  { %4120 = vmatpush3.msra.mxu0 %v2649_v0  ;;  %4158 = vmatprep.mubr.msk.f32.mxu1 %vm4225_vm0, %v4224_v5 }
 0x559   :  { %4121 = vmatprep.subr.mxu0 %v4224_v5  ;;  %4151 = vmatpush3.msra.mxu1 %v3142_v54 }
 0x55a   :  { %4122 = vmatpush3.msra.mxu0 %v2656_v1  ;;  %4152 = vmatprep.subr.mxu1 %v4224_v5 }
 0x55b   :  { %4123 = vmatprep.subr.mxu0 %v4224_v5  ;;  %4153 = vmatpush3.msra.mxu1 %v3149_v58 }
 0x55c   :  { %4124 = vmatpush3.msra.mxu0 %v2663_v2  ;;  %4154 = vmatprep.subr.mxu1 %v4224_v5 }
 0x55d   :  { %4126 = vmatmul.mubr.f32.vlgmr.msra.gmra.mxu0 %v2605_v32  ;;  %4139 = vmatprep.subr.mxu0 %v4224_v5 }
 0x55e   :  { %4147 = vmatprep.mubr.msk.f32.mxu0 %vm4225_vm0, %v4224_v5  ;;  %4140 = vmatpush3.msra.mxu0 %v4933_v38 }
 0x55f   :  { %4141 = vmatprep.subr.mxu0 %v4224_v5  ;;  %4155 = vmatpush3.msra.mxu1 %v3156_v59 }
 0x560   :  { %4142 = vmatpush3.msra.mxu0 %v4947_v43  ;;  %4156 = vmatprep.subr.mxu1 %v4224_v5 }
 0x561   :  { %4143 = vmatprep.subr.mxu0 %v4224_v5  ;;  %4157 = vmatpush3.msra.mxu1 %v3163_v60 }
 0x562   :  { %4144 = vmatpush3.msra.mxu0 %v4949_v44  ;;  %4172 = vmatprep.subr.mxu1 %v4224_v5 }
 0x563   :  { %4145 = vmatprep.subr.mxu0 %v4224_v5 }
 0x564   :  { %4146 = vmatpush3.msra.mxu0 %v4951_v45 }
 0x565   :  { %4161 = vmatprep.subr.mxu0 %v4224_v5 }
 0x603   :  { %v2702_v61 = vpop.f32.mrf.mxu1 }
 0x605   :  { %v4094_v62 = vpop.f32.mrf.mxu1 }
 0x60b   :  { %v2859_v63 = vpop.f32.mrf.mxu1 }
 0x60c   :  { %v2611_v0 = vpop.f32.mrf.mxu0 }
 0x60d   :  { %v4116_v1 = vpop.f32.mrf.mxu1  ;;  %v2612_v4 = vadd.f32 %v3531_v3, %v2611_v0 }
 0x60e   :  { %v4083_v2 = vpop.f32.mrf.mxu0 }
 0x60f   :  { %v2703_v8 = vadd.f32 %v2702_v61, %v2612_v4 }
 0x614   :  { %v2782_v6 = vpop.f32.mrf.mxu0 }
 0x615   :  { %v3017_v7 = vpop.f32.mrf.mxu1  ;;  %v2783_v11 = vadd.f32 %v2782_v6, %v2703_v8 }
 0x616   :  { %v4105_v9 = vpop.f32.mrf.mxu0 }
 0x617   :  { %v4138_v10 = vpop.f32.mrf.mxu1  ;;  %v2860_v12 = vadd.f32 %v2859_v63, %v2783_v11 }
 0x61d   :  { %v2942_v13 = vpop.f32.mrf.mxu0 }
 0x61e   :  { %v2943_v14 = vadd.f32 %v2942_v13, %v2860_v12 }
 0x61f   :  { %v4127_v15 = vpop.f32.mrf.mxu0 }
 0x620   :  { %v3018_v16 = vadd.f32 %v3017_v7, %v2943_v14 }
 0x622   :  { %4221 = vtanh.f32 %v3018_v16 }
 0x62f   :  { %v4222_v17 = vpop.eup %4221 }
 0x630   :  { %v3032_v18 = vsel %vm42_vm1, %v4222_v17, 0 }
 0x631   :  { %v3103_v19 = vand.u32 4294901760, %v3032_v18 }
 0x633   :  { %v3104_v20 = vsub.f32 %v3032_v18, %v3103_v19  ;;  %4159 = vmatmul.mubr.f32.vlgmr.msra.gmra.mxu1 %v3103_v19 }
 0x634   :  { %4173 = vmatpush3.msra.mxu1 %v4933_v38  ;;  %4180 = vmatprep.mubr.msk.f32.mxu1 %vm4225_vm0, %v4224_v5 }
 0x635   :  { %4174 = vmatprep.subr.mxu1 %v4224_v5  ;;  %v3105_v21 = vand.u32 4294901760, %v3104_v20 }
 0x636   :  { %4175 = vmatpush3.msra.mxu1 %v4947_v43 }
 0x637   :  { %4176 = vmatprep.subr.mxu1 %v4224_v5  ;;  %v3106_v22 = vsub.f32 %v3104_v20, %v3105_v21 }
 0x638   :  { %4177 = vmatpush3.msra.mxu1 %v4949_v44 }
 0x639   :  { %4178 = vmatprep.subr.mxu1 %v4224_v5  ;;  %v3107_v23 = vand.u32 4294901760, %v3106_v22 }
 0x63a   :  { %4179 = vmatpush3.msra.mxu1 %v4951_v45 }
 0x63b   :  { %4181 = vmatmul.mubr.f32.vlgmr.msra.gmra.mxu1 %v3105_v21  ;;  %4194 = vmatprep.subr.mxu1 %v4224_v5 }
 0x63c   :  { %4148 = vmatmul.mubr.f32.vlgmr.msra.gmra.mxu0 %v3107_v23  ;;  %4195 = vmatpush3.msra.mxu1 %v4933_v38 }
 0x63d   :  { %4162 = vmatpush3.msra.mxu0 %v4945_v42  ;;  %4196 = vmatprep.subr.mxu1 %v4224_v5 }
 0x63e   :  { %4163 = vmatprep.subr.mxu0 %v4224_v5  ;;  %4197 = vmatpush3.msra.mxu1 %v4947_v43 }
 0x63f   :  { %4164 = vmatpush3.msra.mxu0 %v4957_v47  ;;  %4198 = vmatprep.subr.mxu1 %v4224_v5 }
 0x640   :  { %4165 = vmatprep.subr.mxu0 %v4224_v5  ;;  %4199 = vmatpush3.msra.mxu1 %v4949_v44 }
 0x641   :  { %4166 = vmatpush3.msra.mxu0 %v4960_v48  ;;  %4200 = vmatprep.subr.mxu1 %v4224_v5 }
 0x642   :  { %4167 = vmatprep.subr.mxu0 %v4224_v5  ;;  %4169 = vmatprep.mubr.msk.f32.mxu0 %vm4225_vm0, %v4224_v5 }
 0x643   :  { %4168 = vmatpush3.msra.mxu0 %v4963_v49  ;;  %4201 = vmatpush3.msra.mxu1 %v4951_v45 }
 0x644   :  { %4202 = vmatprep.mubr.msk.f32.mxu1 %vm4225_vm0, %v4224_v5  ;;  %4170 = vmatmul.mubr.f32.vlgmr.msra.gmra.mxu0 %v3104_v20 }
 0x645   :  { %4183 = vmatprep.subr.mxu0 %v4224_v5  ;;  %4203 = vmatmul.mubr.f32.vlgmr.msra.gmra.mxu1 %v3103_v19 }
 0x646   :  { %4184 = vmatpush3.msra.mxu0 %v3140_v46  ;;  %4191 = vmatprep.mubr.msk.f32.mxu0 %vm4225_vm0, %v4224_v5 }
 0x647   :  { %4185 = vmatprep.subr.mxu0 %v4224_v5 }
 0x648   :  { %4186 = vmatpush3.msra.mxu0 %v3147_v51 }
 0x649   :  { %4187 = vmatprep.subr.mxu0 %v4224_v5 }
 0x64a   :  { %4188 = vmatpush3.msra.mxu0 %v3154_v52 }
 0x64b   :  { %4189 = vmatprep.subr.mxu0 %v4224_v5 }
 0x64c   :  { %4190 = vmatpush3.msra.mxu0 %v3161_v53 }
 0x64d   :  { %4192 = vmatmul.mubr.f32.vlgmr.msra.gmra.mxu0 %v3103_v19 }
 0x6f3   :  { %v3200_v24 = vpop.f32.mrf.mxu1 }
 0x6f5   :  { %v4160_v25 = vpop.f32.mrf.mxu1 }
 0x6fb   :  { %v3357_v26 = vpop.f32.mrf.mxu1 }
 0x6fc   :  { %v3109_v27 = vpop.f32.mrf.mxu0 }
 0x6fd   :  { %v4182_v28 = vpop.f32.mrf.mxu1  ;;  %v3110_v31 = vadd.f32 %v3532_v30, %v3109_v27 }
 0x6fe   :  { %v4149_v29 = vpop.f32.mrf.mxu0 }
 0x6ff   :  { %v3201_v34 = vadd.f32 %v3200_v24, %v3110_v31 }
 0x704   :  { %v3280_v32 = vpop.f32.mrf.mxu0 }
 0x705   :  { %v3515_v33 = vpop.f32.mrf.mxu1  ;;  %v3281_v36 = vadd.f32 %v3280_v32, %v3201_v34 }
 0x706   :  { %v4171_v35 = vpop.f32.mrf.mxu0 }
 0x707   :  { %v4204_v5 = vpop.f32.mrf.mxu1  ;;  %v3358_v37 = vadd.f32 %v3357_v26, %v3281_v36 }
 0x70d   :  { %v3440_v38 = vpop.f32.mrf.mxu0 }
 0x70e   :  { %v3441_v39 = vadd.f32 %v3440_v38, %v3358_v37 }
 0x70f   :  { %v4193_v40 = vpop.f32.mrf.mxu0 }
 0x710   :  { %v3516_v41 = vadd.f32 %v3515_v33, %v3441_v39 }
 0x712   :  { %3519 = vst [vmem:[%s5045_s3] sm:$0xff] %v3516_v41 }

</bundles_post_ra>
